<compile_context>
chip_gen: v5e
topology: v5e:2x2
jax: 0.10.0
libtpu: 0.0.40
codegen_flags: <defaults>
</compile_context>

<pallas_src>
import jax
import jax.numpy as jnp
from jax.experimental import pallas as pl
from jax.experimental.pallas import tpu as pltpu

_LANE = 128
_SUBLANE = 8


def _round_up(x, m):
    return -(-x // m) * m


def _pick_out_block(k_flat, n_flat, itemsize, max_weight_bytes=8 << 20):
    """Columns of the fused weight per grid step (full N when it fits)."""
    if k_flat * n_flat * itemsize <= max_weight_bytes or n_flat <= _LANE:
        return n_flat
    bn = _round_up(n_flat, _LANE)
    while bn > _LANE and k_flat * bn * itemsize > max_weight_bytes:
        bn //= 2
    return max(_LANE, (bn // _LANE) * _LANE)


def _pick_batch_block(batch, k_flat, n_blk, itemsize, vmem_budget=12 << 20):
    """Rows per grid step for the (block_b, K) @ (K, block_n) matmul."""
    k_pad = _round_up(max(k_flat, 1), _LANE)
    n_pad = _round_up(max(n_blk, 1), _LANE)
    # double-buffered input + output blocks (native dtype) + one f32 intermediate
    per_row = 2 * (k_pad + n_pad) * itemsize + n_pad * 4
    cap = max(_SUBLANE, int(vmem_budget // per_row))
    bb = min(1024, cap)
    # Keep >= 4 grid steps once the batch is big enough (2 per v7x TensorCore,
    # and at least 2 buffered steps so prefetch/writeback overlap compute),
    # but never drop below 512 rows (measured tile-size roofline knee).
    if batch >= 4 * 512:
        bb = min(bb, max(512, _round_up(batch // 4, _SUBLANE)))
    bb = max(_SUBLANE, (bb // _SUBLANE) * _SUBLANE)
    # no point in a block larger than the (sublane-padded) batch itself
    bb = min(bb, _round_up(batch, _SUBLANE))
    return bb


def gate_conv_kernel(x_ref, w_ref, bias_ref, o_ref):
    # x_ref:    (BB, Cin*L)   lane-dense input rows (native dtype)
    # w_ref:    (Cin*L, BN)   fused conv (x) linear weight (native dtype -> MXU)
    # bias_ref: (1, BN)       combined bias  bc * colsum(Wf^T) + bf   (f32)
    # o_ref:    (BB, BN)      lane-dense output rows
    h = jnp.dot(x_ref[...], w_ref[...], preferred_element_type=jnp.float32)
    h = h + bias_ref[...]                       # (1, BN) row broadcast folds into add
    # TODO(synk): Dropout is identity in eval mode; training-mode dropout not implemented.
    o_ref[...] = (h * jax.nn.sigmoid(h)).astype(o_ref.dtype)   # SiLU in f32 (exp -> EUP)


def gate_conv(x, conv_w, conv_b, fc_w, fc_b, *, block_b=None, block_n=None):
    """x: (B, Cin, L); conv_w: (Cout, Cin, 1); conv_b: (Cout,);
       fc_w: (Out, L); fc_b: (Out,)  ->  (B, Cout, Out)."""
    B, Cin, L = x.shape
    Cout = conv_w.shape[0]
    Out = fc_w.shape[0]
    K = Cin * L
    N = Cout * Out
    itemsize = x.dtype.itemsize

    # ---- weight prep (tiny, once) ----
    wc = conv_w.reshape(Cout, Cin).astype(jnp.float32)        # (Cout, Cin)
    wft = jnp.transpose(fc_w).astype(jnp.float32)             # (L, Out): wft[l,q] = fc_w[q,l]
    # W_fused[c*L+l, o*Out+q] = wc[o,c] * wft[l,q]
    w_fused = (jnp.transpose(wc)[:, None, :, None] * wft[None, :, None, :]
               ).reshape(K, N).astype(x.dtype)
    # (Wc x + bc 1^T) Wf^T + bf  ==  Wc (x Wf^T) + bc * colsum(Wf^T) + bf
    bias = (conv_b.astype(jnp.float32)[:, None] * jnp.sum(wft, axis=0)[None, :]
            + fc_b.astype(jnp.float32)[None, :]).reshape(1, N)

    x2d = x.reshape(B, K)                                      # lane-dense input rows

    if block_n is None:
        block_n = _pick_out_block(K, N, itemsize)
    if block_b is None:
        block_b = _pick_batch_block(B, K, block_n, itemsize)

    B_pad = _round_up(B, block_b)
    N_pad = _round_up(N, block_n)
    if B_pad != B:                                             # no divisor-of-B cliff
        x2d = jnp.pad(x2d, ((0, B_pad - B), (0, 0)))
    if N_pad != N:
        w_fused = jnp.pad(w_fused, ((0, 0), (0, N_pad - N)))
        bias = jnp.pad(bias, ((0, 0), (0, N_pad - N)))

    grid = (B_pad // block_b, N_pad // block_n)

    # explicit VMEM budget: double-buffered in/out/weight/bias blocks + f32 temp
    k_lane = _round_up(K, _LANE)
    n_lane = _round_up(block_n, _LANE)
    vmem_bytes = (2 * block_b * k_lane * itemsize
                  + 2 * block_b * n_lane * itemsize
                  + 2 * _round_up(K, _SUBLANE) * n_lane * itemsize
                  + 2 * _SUBLANE * n_lane * 4
                  + block_b * n_lane * 4)
    vmem_limit = min(max(int(vmem_bytes * 1.5) + (2 << 20), 16 << 20), 48 << 20)

    cost = pl.CostEstimate(
        flops=2 * B_pad * K * N_pad,
        transcendentals=B_pad * N_pad,
        bytes_accessed=(B_pad * K + B_pad * N_pad + K * N_pad) * itemsize + N_pad * 4,
    )

    out2d = pl.pallas_call(
        gate_conv_kernel,
        out_shape=jax.ShapeDtypeStruct((B_pad, N_pad), x.dtype),
        grid_spec=pltpu.PrefetchScalarGridSpec(
            num_scalar_prefetch=0,
            grid=grid,
            in_specs=[
                pl.BlockSpec((block_b, K), lambda b, n: (b, 0)),      # input rows
                pl.BlockSpec((K, block_n), lambda b, n: (0, n)),      # fused weight (grid-invariant in b)
                pl.BlockSpec((1, block_n), lambda b, n: (0, n)),      # combined bias row
            ],
            out_specs=pl.BlockSpec((block_b, block_n), lambda b, n: (b, n)),
        ),
        compiler_params=pltpu.CompilerParams(
            dimension_semantics=("parallel", "parallel"),
            vmem_limit_bytes=vmem_limit),
        cost_estimate=cost,
    )(x2d, w_fused, bias)

    out2d = out2d[:B, :N]
    return out2d.reshape(B, Cout, Out)


def reference(x, conv_w, conv_b, fc_w, fc_b):
    # Pure-JAX reference of the PyTorch forward (eval mode), original op order.
    Cout, Cin, _ = conv_w.shape
    wc = conv_w.reshape(Cout, Cin)
    conv = jnp.einsum("oc,bcl->bol", wc, x) + conv_b[None, :, None]
    h = jnp.einsum("bol,ql->boq", conv, fc_w) + fc_b[None, None, :]
    return h * jax.nn.sigmoid(h)


if __name__ == "__main__":
    # Small shapes consistent with the module:
    B, in_channel, out_channel = 2, 4, 8
    in_size, out_size = 16, 32

    key = jax.random.PRNGKey(0)
    kx, k1, k2, k3, k4 = jax.random.split(key, 5)

    x = jax.random.normal(kx, (B, in_channel, in_size), dtype=jnp.float32)
    conv_w = jax.random.normal(k1, (out_channel, in_channel, 1), dtype=jnp.float32) * 0.1
    conv_b = jax.random.normal(k2, (out_channel,), dtype=jnp.float32) * 0.1
    fc_w = jax.random.normal(k3, (out_size, in_size), dtype=jnp.float32) * 0.1
    fc_b = jax.random.normal(k4, (out_size,), dtype=jnp.float32) * 0.1

    out = gate_conv(x, conv_w, conv_b, fc_w, fc_b)
    out = jax.block_until_ready(out)

    ref = reference(x, conv_w, conv_b, fc_w, fc_b)
    assert out.shape == (B, out_channel, out_size), out.shape
    max_err = float(jnp.max(jnp.abs(out - ref)))
    assert jnp.allclose(out, ref, atol=1e-4, rtol=1e-4), max_err
    print("KERNEL_OK")
</pallas_src>

<mosaic_0001>
module attributes {stable_mosaic.version = 11 : i64} {
  func.func @gate_conv_kernel(%arg0: i32, %arg1: i32, %arg2: memref<8x64xf32, #tpu.memory_space<vmem>>, %arg3: memref<64x256xf32, #tpu.memory_space<vmem>>, %arg4: memref<1x256xf32, #tpu.memory_space<vmem>>, %arg5: memref<8x256xf32, #tpu.memory_space<vmem>>) attributes {dimension_semantics = [#tpu.dimension_semantics<parallel>, #tpu.dimension_semantics<parallel>], iteration_bounds = array<i64: 1, 1>, scalar_prefetch = 0 : i64, scratch_operands = 0 : i64, tpu.core_type = #tpu.core_type<tc>, window_params = [{transform_indices = @transform_0, window_bounds = array<i64: 8, 64>}, {transform_indices = @transform_1, window_bounds = array<i64: 64, 256>}, {transform_indices = @transform_2, window_bounds = array<i64: 1, 256>}, {transform_indices = @transform_3, window_bounds = array<i64: 8, 256>}]} {
    %c0 = arith.constant 0 : index
    %c0_0 = arith.constant 0 : index
    %0 = vector.load %arg2[%c0, %c0_0] : memref<8x64xf32, #tpu.memory_space<vmem>>, vector<8x64xf32>
    %c0_1 = arith.constant 0 : index
    %c0_2 = arith.constant 0 : index
    %1 = vector.load %arg3[%c0_1, %c0_2] : memref<64x256xf32, #tpu.memory_space<vmem>>, vector<64x256xf32>
    %cst = arith.constant dense<0.000000e+00> : vector<8x256xf32>
    %2 = tpu.matmul %0, %1, %cst {dimension_numbers = #tpu.dot_dimension_numbers<[1], [0], [0], [1], [0, 0, 1, 1], [], []>} : vector<8x64xf32>, vector<64x256xf32>, vector<8x256xf32> -> vector<8x256xf32>
    %c0_3 = arith.constant 0 : index
    %c0_4 = arith.constant 0 : index
    %3 = vector.load %arg4[%c0_3, %c0_4] : memref<1x256xf32, #tpu.memory_space<vmem>>, vector<1x256xf32>
    %4 = vector.broadcast %3 : vector<1x256xf32> to vector<8x256xf32>
    %5 = arith.addf %2, %4 : vector<8x256xf32>
    %6 = arith.negf %5 : vector<8x256xf32>
    %7 = math.exp %6 : vector<8x256xf32>
    %cst_5 = arith.constant 1.000000e+00 : f32
    %8 = vector.broadcast %cst_5 : f32 to vector<8x256xf32>
    %9 = arith.addf %8, %7 : vector<8x256xf32>
    %10 = arith.divf %8, %9 : vector<8x256xf32>
    %11 = arith.mulf %5, %10 : vector<8x256xf32>
    %c0_6 = arith.constant 0 : index
    %c0_7 = arith.constant 0 : index
    %12 = vector.load %arg5[%c0_6, %c0_7] : memref<8x256xf32, #tpu.memory_space<vmem>>, vector<8x256xf32>
    tpu.vector_store %arg5[%c0_6, %c0_7], %11 {strides = array<i32>} : memref<8x256xf32, #tpu.memory_space<vmem>>, vector<8x256xf32>,
    return
  }
  func.func @transform_0(%arg0: i32, %arg1: i32) -> (i32, i32) {
    %c0_i32 = arith.constant 0 : i32
    %c0_i32_0 = arith.constant 0 : i32
    return %arg0, %c0_i32 : i32, i32
  }
  func.func @transform_1(%arg0: i32, %arg1: i32) -> (i32, i32) {
    %c0_i32 = arith.constant 0 : i32
    %c0_i32_0 = arith.constant 0 : i32
    return %c0_i32, %arg1 : i32, i32
  }
  func.func @transform_2(%arg0: i32, %arg1: i32) -> (i32, i32) {
    %c0_i32 = arith.constant 0 : i32
    %c0_i32_0 = arith.constant 0 : i32
    return %c0_i32, %arg1 : i32, i32
  }
  func.func @transform_3(%arg0: i32, %arg1: i32) -> (i32, i32) {
    %c0_i32 = arith.constant 0 : i32
    return %arg0, %arg1 : i32, i32
  }
}

</mosaic_0001>

<bundles_post_ra>
// kernel: tpu_custom_call.1
= control target key start
LH: loop header
LB: loop body
LE: loop exit
PB: predicated region body
PF: predicated region fallthrough
CT: control target
= control target key end

     0   :  { %8 = vsyncpa [#allocation3], 0  ;;  %s343_s0 = inlined_call_operand.hbm [shape: f32[8,64], index: 0, kind: input, shape index: {}]   ;;  %s344_s1 = inlined_call_operand.hbm [shape: f32[64,256], index: 1, kind: input, shape index: {}]   ;;  %s345_s2 = inlined_call_operand.hbm [shape: f32[1,256], index: 2, kind: input, shape index: {}]   ;;  %s346_s3 = inlined_call_operand.hbm [shape: f32[8,256], index: 3, kind: output, shape index: {}]  }
   0x1   :  { %9 = vsyncpa [#allocation6], 0  ;;  %s26_s14 = sshll.u32 %s344_s1, 4  ;;  %s27_s14 = int_to_ptr.hbm [resolvable:$true] %s26_s14 }
   0x2   :  { %10 = vsyncpa [#allocation4], 0  ;;  %s305_s15 = smov [#allocation5]   ;;  %s16_s19 = sshll.u32 %s343_s0, 4  ;;  %s17_s19 = int_to_ptr.hbm [resolvable:$true] %s16_s19 }
   0x3   :  { %s28_s16 = sshll.u32 %s305_s15, 4  ;;  %s306_s20 = smov 256   ;;  %s29_s16 = int_to_ptr.vmem [resolvable:$true] %s28_s16 }
   0x4   :  { %s307_s21 = smov 16   ;;  %s308_s22 = smov [#allocation2]  }
   0x5   :  { %34 = dma.hbm_to_vmem [thread:$0]  %s27_s14, 2048, %s29_s16, [#allocation6], %s306_s20, %s306_s20, %s307_s21  }
   0x6   :  { %s18_s23 = sshll.u32 %s308_s22, 4  ;;  %s40_s26 = sshll.u32 %s345_s2, 4  ;;  %s19_s23 = int_to_ptr.vmem [resolvable:$true] %s18_s23  ;;  %s41_s26 = int_to_ptr.hbm [resolvable:$true] %s40_s26 }
   0x7   :  { %21 = dma.hbm_to_vmem [thread:$0]  %s17_s19, 128, %s19_s23, [#allocation3]  }
   0x8   :  { %s309_s1 = smov [#allocation7]  }
   0x9   :  { %s42_s27 = sshll.u32 %s309_s1, 4  ;;  %s43_s27 = int_to_ptr.vmem [resolvable:$true] %s42_s27 }
   0xa   :  { %45 = dma.hbm_to_vmem [thread:$0]  %s41_s26, 32, %s43_s27, [#allocation6]  }
   0xb   :  { %299 = dma.done.wait [#allocation3], 128  }
   0xc   :  { %300 = vsyncadd [#allocation3], 4294967168 }
   0xd   :  { %301 = dma.done.wait [#allocation6], 2080  }
   0xe   :  { %302 = vsyncadd [#allocation6], 4294965216  ;;  %v73_v0 = vld [vmem:[#allocation5 + $0x70] sm:$0xff]  ;;  %v74_v1 = vld [vmem:[#allocation5 + $0x78] sm:$0xff]  ;;  %vm81_vm0 = vcmask 523264   ;;  %s310_s0 = smov [#allocation8]  }
   0xf   :  { %v71_v2 = vld [vmem:[#allocation5 + $0x60] sm:$0xff]  ;;  %93 = vmatpush.msra.mxu0 %v73_v0  ;;  %113 = vmatpush.msra.mxu1 %v74_v1  ;;  %v72_v3 = vld [vmem:[#allocation5 + $0x68] sm:$0xff]  ;;  %v69_v4 = vld [vmem:[#allocation5 + $0x50] sm:$0xff]  ;;  %s172_s2 = sshll.u32 %s310_s0, 4  ;;  %s174_s30 = sshll.u32 %s346_s3, 4  ;;  %s173_s2 = int_to_ptr.vmem [resolvable:$true] %s172_s2  ;;  %s175_s30 = int_to_ptr.hbm [resolvable:$true] %s174_s30 }
  0x10   :  { %v70_v5 = vld [vmem:[#allocation5 + $0x58] sm:$0xff]  ;;  %v67_v6 = vld [vmem:[#allocation5 + $0x40] sm:$0xff]  ;;  %v68_v7 = vld [vmem:[#allocation5 + $0x48] sm:$0xff] }
  0x11   :  { %94 = vmatpush.msra.mxu0 %v71_v2  ;;  %114 = vmatpush.msra.mxu1 %v72_v3  ;;  %v65_v8 = vld [vmem:[#allocation5 + $0x30] sm:$0xff]  ;;  %v66_v9 = vld [vmem:[#allocation5 + $0x38] sm:$0xff]  ;;  %v63_v10 = vld [vmem:[#allocation5 + $0x20] sm:$0xff] }
  0x12   :  { %v64_v11 = vld [vmem:[#allocation5 + $0x28] sm:$0xff]  ;;  %v61_v12 = vld [vmem:[#allocation5 + $0x10] sm:$0xff]  ;;  %v62_v13 = vld [vmem:[#allocation5 + $0x18] sm:$0xff] }
  0x13   :  { %95 = vmatpush.msra.mxu0 %v69_v4  ;;  %115 = vmatpush.msra.mxu1 %v70_v5  ;;  %v59_v14 = vld [vmem:[#allocation5] sm:$0xff]  ;;  %v60_v15 = vld [vmem:[#allocation5 + $0x8] sm:$0xff]  ;;  %v58_v16 = vld [vmem:[#allocation2] sm:$0xff] }
  0x14   :  { %v75_v17 = vld [vmem:[#allocation7] sm:$0x3] }
  0x15   :  { %96 = vmatpush.msra.mxu0 %v67_v6  ;;  %116 = vmatpush.msra.mxu1 %v68_v7  ;;  %v77_v18 = vperm.slane %v75_v17, 0  ;;  %v78_v19 = vperm.slane %v75_v17, 1 }
  0x17   :  { %97 = vmatpush.msra.mxu0 %v65_v8  ;;  %117 = vmatpush.msra.mxu1 %v66_v9 }
  0x19   :  { %98 = vmatpush.msra.mxu0 %v63_v10  ;;  %118 = vmatpush.msra.mxu1 %v64_v11 }
  0x1b   :  { %99 = vmatpush.msra.mxu0 %v61_v12  ;;  %119 = vmatpush.msra.mxu1 %v62_v13 }
  0x1d   :  { %100 = vmatpush.msra.mxu0 %v59_v14  ;;  %120 = vmatpush.msra.mxu1 %v60_v15 }
  0x1e   :  { %185 = vmatmul.msk.f32.vlgmr.msra.gmra.mxu0 %vm81_vm0, %v58_v16  ;;  %186 = vmatmul.msk.f32.vlgmr.msra.gmra.mxu1 %vm81_vm0, %v58_v16 }
  0x9b   :  { %v102_v20 = vpop.f32.mrf.mxu0  ;;  %v122_v21 = vpop.f32.mrf.mxu1 }
  0x9c   :  { %v103_v22 = vadd.f32 %v102_v20, %v77_v18  ;;  %v123_v23 = vadd.f32 %v122_v21, %v78_v19 }
  0x9e   :  { %v187_v24 = vmul.f32 -1.442695, %v103_v22  ;;  %v188_v25 = vmul.f32 -1.442695, %v123_v23 }
  0xa0   :  { %195 = vpow2.f32 %v187_v24 }
  0xa1   :  { %197 = vpow2.f32 %v188_v25 }
  0xa6   :  { %v196_v26 = vpop.eup %195 }
  0xa7   :  { %v198_v27 = vpop.eup %197  ;;  %v131_v28 = vadd.f32 1.0, %v196_v26 }
  0xa8   :  { %v132_v29 = vadd.f32 1.0, %v198_v27 }
  0xa9   :  { %199 = vrcp.f32 %v131_v28  ;;  %v144_v35 = vand.u32 2147483648, %v131_v28  ;;  %v142_v38 = vand.u32 2147483647, %v131_v28  ;;  %vm138_vm3 = vweird.f32 %v131_v28 }
  0xaa   :  { %201 = vrcp.f32 %v132_v29  ;;  %v159_v39 = vand.u32 2147483648, %v132_v29  ;;  %v157_v41 = vand.u32 2147483647, %v132_v29  ;;  %vm153_vm5 = vweird.f32 %v132_v29 }
  0xab   :  { %v145_v43 = vor.u32 1.1754944e-38, %v144_v35  ;;  %vm143_vm6 = vcmp.eq.f32.partialorder %v142_v38, 8.507059e+37 }
  0xac   :  { %v160_v46 = vor.u32 1.1754944e-38, %v159_v39  ;;  %vm158_vm8 = vcmp.eq.f32.partialorder %v157_v41, 8.507059e+37 }
  0xaf   :  { %v200_v30 = vpop.eup %199 }
  0xb0   :  { %v202_v31 = vpop.eup %201  ;;  %v134_v32 = vmul.f32 %v200_v30, %v131_v28  ;;  %vm139_vm1 = vweird.f32 %v200_v30 }
  0xb1   :  { %v149_v33 = vmul.f32 %v202_v31, %v132_v29  ;;  %vm154_vm2 = vweird.f32 %v202_v31  ;;  %vm140_vm4 = vmor %vm138_vm3, %vm139_vm1 }
  0xb2   :  { %v135_v34 = vsub.f32 1.0, %v134_v32  ;;  %vm155_vm7 = vmor %vm153_vm5, %vm154_vm2 }
  0xb3   :  { %v150_v36 = vsub.f32 1.0, %v149_v33 }
  0xb4   :  { %v136_v37 = vmul.f32 %v200_v30, %v135_v34 }
  0xb5   :  { %v151_v40 = vmul.f32 %v202_v31, %v150_v36 }
  0xb6   :  { %v137_v42 = vadd.f32 %v200_v30, %v136_v37 }
  0xb7   :  { %v152_v44 = vadd.f32 %v202_v31, %v151_v40 }
  0xb8   :  { %v141_v45 = vsel %vm140_vm4, %v200_v30, %v137_v42 }
  0xb9   :  { %v146_v47 = vsel %vm143_vm6, %v145_v43, %v141_v45  ;;  %v156_v48 = vsel %vm155_vm7, %v202_v31, %v152_v44 }
  0xba   :  { %v163_v49 = vmul.f32 %v146_v47, %v103_v22  ;;  %v161_v50 = vsel %vm158_vm8, %v160_v46, %v156_v48 }
  0xbb   :  { %v164_v51 = vmul.f32 %v161_v50, %v123_v23 }
  0xbc   :  { %165 = vst [vmem:[#allocation8] sm:$0xff] %v163_v49 }
  0xbd   :  { %166 = vst [vmem:[#allocation8 + $0x8] sm:$0xff] %v164_v51 }
  0xbe   :  { %177 = dma.vmem_to_hbm [thread:$0]  %s173_s2, 256, %s175_s30, [#allocation4]  }
  0xbf   :  { %303 = dma.done.wait [#allocation4], 256  }
  0xc0   :  { %304 = vsyncadd [#allocation4], 4294967040 }
  0xc1   :  { %182 = vsyncpa [#allocation3], 1 }
  0xc2   :  { %183 = vsyncpa [#allocation6], 1 }
  0xc3   :  { %184 = vsyncpa [#allocation4], 1 }

</bundles_post_ra>
